<compile_context>
chip_gen: v5e
topology: v5e:2x2
jax: 0.10.0
libtpu: 0.0.40
codegen_flags: <defaults>
</compile_context>

<pallas_src>
import functools

import jax
import jax.numpy as jnp
from jax.experimental import pallas as pl
from jax.experimental.pallas import tpu as pltpu


_LANE = 128
_SUBLANE = 8


def _round_up(x, m):
    return (x + m - 1) // m * m


def _softsign_in_kernel(x):
    # Route the reciprocal to the EUP slot (free under the MXU-bound regime)
    # instead of a full-precision divide.
    return x * pl.reciprocal(1.0 + jnp.abs(x), approx=True)


# Activations used inside the kernel (may use Pallas primitives).
_ACTIVATIONS_KERNEL = {
    "sigmoid": jax.nn.sigmoid,
    "tanh": jnp.tanh,
    "softsign": _softsign_in_kernel,
    "relu": jax.nn.relu,
    "tanshrink": lambda x: x - jnp.tanh(x),
}

# Activations used by the pure-JAX reference (host side).
_ACTIVATIONS_REF = {
    "sigmoid": jax.nn.sigmoid,
    "tanh": jnp.tanh,
    "softsign": jax.nn.soft_sign,
    "relu": jax.nn.relu,
    "tanshrink": lambda x: x - jnp.tanh(x),
}


def prepare_params(params, matmul_dtype=jnp.bfloat16):
    """One-time parameter prep (hoisted out of the forward pass).

    params: list of (W, b) with W shaped (out_dim, in_dim) like torch.nn.Linear.

    Returns pre-transposed weights with ONLY the hidden dims padded to 128:
      * first layer's contraction dim  == in_feature  (x needs no host pad)
      * last  layer's output dim       == out_feature (no post-kernel slice)
    Weights are cast to `matmul_dtype` (bf16 by default: native MXU operand on
    v5e/v6e/v7x); biases stay f32 so the add lands on the f32 accumulator.
    Zero padding is exact: padded weight rows/cols and biases are zero.
    """
    n = len(params)
    layers = []
    for idx, (w, b) in enumerate(params):
        out_dim, in_dim = w.shape
        in_pad = in_dim if idx == 0 else _round_up(in_dim, _LANE)
        out_pad = out_dim if idx == n - 1 else _round_up(out_dim, _LANE)
        wt = jnp.zeros((in_pad, out_pad), matmul_dtype).at[:in_dim, :out_dim].set(
            w.T.astype(matmul_dtype))
        b2 = jnp.zeros((1, out_pad), jnp.float32).at[0, :out_dim].set(
            b.astype(jnp.float32))
        layers.append((wt, b2))
    return {
        "layers": layers,
        "in_feature": params[0][0].shape[1],
        "out_feature": params[-1][0].shape[0],
        "matmul_dtype": matmul_dtype,
    }


def _mlp_kernel(n_layers, activation, matmul_dtype, *refs):
    """Fused MLP forward on one batch tile.

    refs = (x_ref, w0_ref, b0_ref, ..., w{L-1}_ref, b{L-1}_ref, o_ref)
    """
    x_ref = refs[0]
    o_ref = refs[-1]
    param_refs = refs[1:-1]

    # Elementwise math in f32 (native on every generation, incl. v5e VPU/EUP);
    # matmul operands cast to `matmul_dtype` (bf16 default) with f32 accumulate.
    h = x_ref[...].astype(jnp.float32)
    for layer in range(n_layers):
        w = param_refs[2 * layer][...]        # VMEM-resident across grid steps
        b = param_refs[2 * layer + 1][...]    # (1, width), f32
        h = jnp.dot(h.astype(matmul_dtype), w,
                    preferred_element_type=jnp.float32) + b
        if layer != n_layers - 1:
            h = activation(h)
    o_ref[...] = h.astype(o_ref.dtype)


def _vmem_capacity_bytes():
    try:
        return pltpu.get_tpu_info().vmem_capacity_bytes
    except Exception:
        return 64 << 20  # conservative (v7x per-TC figure)


def _default_batch_tile():
    # Bigger tiles on 128 MiB parts (v5e/v6e); smaller on v7x (64 MiB per TC).
    return 4096 if _vmem_capacity_bytes() >= (128 << 20) else 2048


def _vmem_limit_bytes(tb, in_feature, out_feature, layers, x_itemsize):
    """Explicit scoped-VMEM budget: double-buffered x/out tiles + resident
    (double-buffered) weights + f32 layer intermediates + margin."""
    max_w = max([in_feature, out_feature] + [wt.shape[1] for wt, _ in layers])
    io = 2 * tb * (in_feature + out_feature) * x_itemsize
    weights = 2 * sum(wt.size * wt.dtype.itemsize + b.size * b.dtype.itemsize
                      for wt, b in layers)
    inter = (len(layers) + 2) * tb * max_w * 4
    needed = io + weights + inter + (4 << 20)
    cap = (96 << 20) if _vmem_capacity_bytes() >= (128 << 20) else (48 << 20)
    return int(min(max(needed, 32 << 20), cap))


def nonlinear_network_forward(x, prepared, activation_tag="tanh",
                              batch_tile=None):
    """Forward pass of NonlinearNetwork via one fused Pallas kernel."""
    activation = _ACTIVATIONS_KERNEL[activation_tag]
    layers = prepared["layers"]
    n_layers = len(layers)
    in_feature = prepared["in_feature"]
    out_feature = prepared["out_feature"]
    matmul_dtype = prepared["matmul_dtype"]

    batch = x.shape[0]
    assert x.shape[1] == in_feature

    tb = batch_tile if batch_tile is not None else _default_batch_tile()
    tb = _round_up(max(1, min(tb, batch)), _SUBLANE)
    if batch > _SUBLANE:
        # >= 2 grid steps so v7x's two TensorCores both engage on the
        # "parallel" batch axis; the extra step is ~0.35us elsewhere.
        tb = min(tb, _round_up(pl.cdiv(batch, 2), _SUBLANE))
    grid = (pl.cdiv(batch, tb),)

    flat_args = [x]
    # Input block: last dim == full feature dim (legal even when < 128), so no
    # host-side feature padding / extra HBM pad pass is needed.
    in_specs = [pl.BlockSpec((tb, in_feature), lambda i: (i, 0))]
    for wt, b2 in layers:
        flat_args.append(wt)
        flat_args.append(b2)
        # Constant index_map -> weights/biases DMA'd once, VMEM-resident.
        in_specs.append(pl.BlockSpec(wt.shape, lambda i: (0, 0)))
        in_specs.append(pl.BlockSpec(b2.shape, lambda i: (0, 0)))

    # Cost estimate from the real (unpadded where possible) shapes.
    flops = 2 * batch * sum(wt.shape[0] * wt.shape[1] for wt, _ in layers)
    transcendentals = batch * sum(wt.shape[1] for wt, _ in layers[:-1])
    bytes_accessed = (
        x.size * x.dtype.itemsize
        + batch * out_feature * x.dtype.itemsize
        + sum(wt.size * wt.dtype.itemsize + b2.size * b2.dtype.itemsize
              for wt, b2 in layers))

    kernel = functools.partial(_mlp_kernel, n_layers, activation, matmul_dtype)

    out = pl.pallas_call(
        kernel,
        out_shape=jax.ShapeDtypeStruct((batch, out_feature), x.dtype),
        grid=grid,
        in_specs=in_specs,
        # Last dim == out_feature: the kernel writes exactly the real output,
        # no 32x-overpadded buffer and no trailing slice pass.
        out_specs=pl.BlockSpec((tb, out_feature), lambda i: (i, 0)),
        compiler_params=pltpu.CompilerParams(
            dimension_semantics=("parallel",),
            vmem_limit_bytes=_vmem_limit_bytes(
                tb, in_feature, out_feature, layers, x.dtype.itemsize)),
        cost_estimate=pl.CostEstimate(
            flops=flops,
            transcendentals=transcendentals,
            bytes_accessed=bytes_accessed),
    )(*flat_args)

    return out


def make_params(key, in_feature, out_feature, n_hidden=1, n_neuron=40,
                dtype=jnp.float32):
    """Deterministic init mimicking torch.nn.Linear default (uniform +-1/sqrt(fan_in))."""
    dims = [in_feature] + [n_neuron] * (n_hidden + 1) + [out_feature]
    params = []
    for i in range(len(dims) - 1):
        fan_in, fan_out = dims[i], dims[i + 1]
        key, kw, kb = jax.random.split(key, 3)
        bound = 1.0 / (fan_in ** 0.5)
        w = jax.random.uniform(kw, (fan_out, fan_in), dtype, -bound, bound)
        b = jax.random.uniform(kb, (fan_out,), dtype, -bound, bound)
        params.append((w, b))
    return params


def reference_forward(x, params, activation_tag="tanh"):
    act = _ACTIVATIONS_REF[activation_tag]
    h = x
    for i, (w, b) in enumerate(params):
        h = h @ w.T + b
        if i != len(params) - 1:
            h = act(h)
    return h


if __name__ == "__main__":
    key = jax.random.PRNGKey(0)
    in_feature, out_feature = 8, 4
    n_hidden, n_neuron = 1, 40

    kx, kp, kx2 = jax.random.split(key, 3)
    params = make_params(kp, in_feature, out_feature, n_hidden, n_neuron)

    # Case 1: strict-f32 matmul-operand path, small batch (2-step grid),
    # tight tolerance against the pure-JAX reference.
    prepared_f32 = prepare_params(params, matmul_dtype=jnp.float32)
    batch = 16
    x = jax.random.normal(kx, (batch, in_feature), jnp.float32)
    out = jax.block_until_ready(
        nonlinear_network_forward(x, prepared_f32, activation_tag="tanh"))
    ref = reference_forward(x, params, activation_tag="tanh")
    assert out.shape == (batch, out_feature)
    assert jnp.allclose(out, ref, atol=1e-5, rtol=1e-5), "mismatch (f32 path)"

    # Case 2: default bf16 MXU-operand path, batch not divisible by the tile
    # (exercises the partial final block + masked output store).  Looser
    # tolerance reflects bf16 matmul operands (f32 accumulation).
    prepared_bf16 = prepare_params(params)  # bf16 weights
    batch2 = 200
    x2 = jax.random.normal(kx2, (batch2, in_feature), jnp.float32)
    out2 = jax.block_until_ready(
        nonlinear_network_forward(x2, prepared_bf16, activation_tag="tanh",
                                  batch_tile=64))
    ref2 = reference_forward(x2, params, activation_tag="tanh")
    assert out2.shape == (batch2, out_feature)
    assert jnp.allclose(out2, ref2, atol=3e-2, rtol=3e-2), "mismatch (bf16 path)"

    print("KERNEL_OK")
</pallas_src>

<mosaic_0001>
module attributes {stable_mosaic.version = 11 : i64} {
  func.func @_mlp_kernel(%arg0: i32, %arg1: memref<8x8xf32, #tpu.memory_space<vmem>>, %arg2: memref<8x128xf32, #tpu.memory_space<vmem>>, %arg3: memref<1x128xf32, #tpu.memory_space<vmem>>, %arg4: memref<128x128xf32, #tpu.memory_space<vmem>>, %arg5: memref<1x128xf32, #tpu.memory_space<vmem>>, %arg6: memref<128x4xf32, #tpu.memory_space<vmem>>, %arg7: memref<1x4xf32, #tpu.memory_space<vmem>>, %arg8: memref<8x4xf32, #tpu.memory_space<vmem>>) attributes {dimension_semantics = [#tpu.dimension_semantics<parallel>], iteration_bounds = array<i64: 2>, scalar_prefetch = 0 : i64, scratch_operands = 0 : i64, tpu.core_type = #tpu.core_type<tc>, window_params = [{transform_indices = @transform_0, window_bounds = array<i64: 8, 8>}, {pipeline_mode = #tpu.pipeline_mode<synchronous>, transform_indices = @transform_1, window_bounds = array<i64: 8, 128>}, {pipeline_mode = #tpu.pipeline_mode<synchronous>, transform_indices = @transform_2, window_bounds = array<i64: 1, 128>}, {pipeline_mode = #tpu.pipeline_mode<synchronous>, transform_indices = @transform_3, window_bounds = array<i64: 128, 128>}, {pipeline_mode = #tpu.pipeline_mode<synchronous>, transform_indices = @transform_4, window_bounds = array<i64: 1, 128>}, {pipeline_mode = #tpu.pipeline_mode<synchronous>, transform_indices = @transform_5, window_bounds = array<i64: 128, 4>}, {pipeline_mode = #tpu.pipeline_mode<synchronous>, transform_indices = @transform_6, window_bounds = array<i64: 1, 4>}, {transform_indices = @transform_7, window_bounds = array<i64: 8, 4>}]} {
    %c0 = arith.constant 0 : index
    %c0_0 = arith.constant 0 : index
    %0 = vector.load %arg1[%c0, %c0_0] : memref<8x8xf32, #tpu.memory_space<vmem>>, vector<8x8xf32>
    %c0_1 = arith.constant 0 : index
    %c0_2 = arith.constant 0 : index
    %1 = vector.load %arg2[%c0_1, %c0_2] : memref<8x128xf32, #tpu.memory_space<vmem>>, vector<8x128xf32>
    %c0_3 = arith.constant 0 : index
    %c0_4 = arith.constant 0 : index
    %2 = vector.load %arg3[%c0_3, %c0_4] : memref<1x128xf32, #tpu.memory_space<vmem>>, vector<1x128xf32>
    %cst = arith.constant dense<0.000000e+00> : vector<8x128xf32>
    %3 = tpu.matmul %0, %1, %cst {dimension_numbers = #tpu.dot_dimension_numbers<[1], [0], [0], [1], [0, 0, 1, 1], [], []>} : vector<8x8xf32>, vector<8x128xf32>, vector<8x128xf32> -> vector<8x128xf32>
    %4 = vector.broadcast %2 : vector<1x128xf32> to vector<8x128xf32>
    %5 = arith.addf %3, %4 : vector<8x128xf32>
    %6 = math.tanh %5 : vector<8x128xf32>
    %c0_5 = arith.constant 0 : index
    %c0_6 = arith.constant 0 : index
    %7 = vector.load %arg4[%c0_5, %c0_6] : memref<128x128xf32, #tpu.memory_space<vmem>>, vector<128x128xf32>
    %c0_7 = arith.constant 0 : index
    %c0_8 = arith.constant 0 : index
    %8 = vector.load %arg5[%c0_7, %c0_8] : memref<1x128xf32, #tpu.memory_space<vmem>>, vector<1x128xf32>
    %cst_9 = arith.constant dense<0.000000e+00> : vector<8x128xf32>
    %9 = tpu.matmul %6, %7, %cst_9 {dimension_numbers = #tpu.dot_dimension_numbers<[1], [0], [0], [1], [0, 0, 1, 1], [], []>} : vector<8x128xf32>, vector<128x128xf32>, vector<8x128xf32> -> vector<8x128xf32>
    %10 = vector.broadcast %8 : vector<1x128xf32> to vector<8x128xf32>
    %11 = arith.addf %9, %10 : vector<8x128xf32>
    %12 = math.tanh %11 : vector<8x128xf32>
    %c0_10 = arith.constant 0 : index
    %c0_11 = arith.constant 0 : index
    %13 = vector.load %arg6[%c0_10, %c0_11] : memref<128x4xf32, #tpu.memory_space<vmem>>, vector<128x4xf32>
    %c0_12 = arith.constant 0 : index
    %c0_13 = arith.constant 0 : index
    %14 = vector.load %arg7[%c0_12, %c0_13] : memref<1x4xf32, #tpu.memory_space<vmem>>, vector<1x4xf32>
    %cst_14 = arith.constant dense<0.000000e+00> : vector<8x4xf32>
    %15 = tpu.matmul %12, %13, %cst_14 {dimension_numbers = #tpu.dot_dimension_numbers<[1], [0], [0], [1], [0, 0, 1, 1], [], []>} : vector<8x128xf32>, vector<128x4xf32>, vector<8x4xf32> -> vector<8x4xf32>
    %16 = vector.broadcast %14 : vector<1x4xf32> to vector<8x4xf32>
    %17 = arith.addf %15, %16 : vector<8x4xf32>
    %c0_15 = arith.constant 0 : index
    %c0_16 = arith.constant 0 : index
    %18 = vector.load %arg8[%c0_15, %c0_16] : memref<8x4xf32, #tpu.memory_space<vmem>>, vector<8x4xf32>
    tpu.vector_store %arg8[%c0_15, %c0_16], %17 {strides = array<i32>} : memref<8x4xf32, #tpu.memory_space<vmem>>, vector<8x4xf32>,
    return
  }
  func.func @transform_0(%arg0: i32) -> (i32, i32) {
    %c0_i32 = arith.constant 0 : i32
    %c0_i32_0 = arith.constant 0 : i32
    return %arg0, %c0_i32 : i32, i32
  }
  func.func @transform_1(%arg0: i32) -> (i32, i32) {
    %c0_i32 = arith.constant 0 : i32
    %c0_i32_0 = arith.constant 0 : i32
    %c0_i32_1 = arith.constant 0 : i32
    return %c0_i32, %c0_i32_0 : i32, i32
  }
  func.func @transform_2(%arg0: i32) -> (i32, i32) {
    %c0_i32 = arith.constant 0 : i32
    %c0_i32_0 = arith.constant 0 : i32
    %c0_i32_1 = arith.constant 0 : i32
    return %c0_i32, %c0_i32_0 : i32, i32
  }
  func.func @transform_3(%arg0: i32) -> (i32, i32) {
    %c0_i32 = arith.constant 0 : i32
    %c0_i32_0 = arith.constant 0 : i32
    %c0_i32_1 = arith.constant 0 : i32
    return %c0_i32, %c0_i32_0 : i32, i32
  }
  func.func @transform_4(%arg0: i32) -> (i32, i32) {
    %c0_i32 = arith.constant 0 : i32
    %c0_i32_0 = arith.constant 0 : i32
    %c0_i32_1 = arith.constant 0 : i32
    return %c0_i32, %c0_i32_0 : i32, i32
  }
  func.func @transform_5(%arg0: i32) -> (i32, i32) {
    %c0_i32 = arith.constant 0 : i32
    %c0_i32_0 = arith.constant 0 : i32
    %c0_i32_1 = arith.constant 0 : i32
    return %c0_i32, %c0_i32_0 : i32, i32
  }
  func.func @transform_6(%arg0: i32) -> (i32, i32) {
    %c0_i32 = arith.constant 0 : i32
    %c0_i32_0 = arith.constant 0 : i32
    %c0_i32_1 = arith.constant 0 : i32
    return %c0_i32, %c0_i32_0 : i32, i32
  }
  func.func @transform_7(%arg0: i32) -> (i32, i32) {
    %c0_i32 = arith.constant 0 : i32
    %c0_i32_0 = arith.constant 0 : i32
    return %arg0, %c0_i32 : i32, i32
  }
}

</mosaic_0001>

<bundles_post_ra>
// kernel: tpu_custom_call.1
= control target key start
LH: loop header
LB: loop body
LE: loop exit
PB: predicated region body
PF: predicated region fallthrough
CT: control target
= control target key end

     0   :  { %s514_s24 = smov 0   ;;  %s646_s0 = inlined_call_operand.vmem [shape: f32[16,8], index: 0, kind: input, shape index: {}]   ;;  %s647_s1 = inlined_call_operand.vmem [shape: f32[8,128], index: 1, kind: input, shape index: {}]   ;;  %s648_s2 = inlined_call_operand.vmem [shape: f32[1,128], index: 2, kind: input, shape index: {}]   ;;  %s649_s3 = inlined_call_operand.vmem [shape: f32[128,128], index: 3, kind: input, shape index: {}]   ;;  %s650_s4 = inlined_call_operand.vmem [shape: f32[1,128], index: 4, kind: input, shape index: {}]   ;;  %s651_s5 = inlined_call_operand.vmem [shape: f32[128,4], index: 5, kind: input, shape index: {}]   ;;  %s652_s6 = inlined_call_operand.vmem [shape: f32[1,4], index: 6, kind: input, shape index: {}]   ;;  %s653_s7 = inlined_call_operand.vmem [shape: f32[16,4], index: 7, kind: output, shape index: {}]  }
   0x1 LB: > { %s441_s25 = sadd.s32 4294967295, %s472_s24   ;;  %p445_p0 = scmp.ge.s32.totalorder %s472_s24, 1  ;;  %s472_s24 = sphi %s514_s24, %s17_s24  }
   0x2   : > { %p236_p1 = scmp.lt.s32.totalorder %s472_s24, 3 }
   0x4   : > { %p237_p2 = pnand %p445_p0, %p236_p1 }
   0x5   : > { %p266_p3 = scmp.lt.s32.totalorder (!%p237_p2), %s441_s25, 1 }
   0x6   : > { %240 = sbr.rel (%p237_p2) target bundleno = 420 (0x1a4), region = 48 }
   0xb   : > { %v275_v0 = vld [vmem:[%s647_s1] sm:$0xff]  ;;  %v320_v1 = vld [vmem:[%s649_s3 + $0x78] sm:$0xff]  ;;  %v319_v2 = vld [vmem:[%s649_s3 + $0x70] sm:$0xff]  ;;  %s655_s25 = smov (!%p266_p3, %s441_s25), 1  ;;  %vm280_vm0 = vcmask 64512   ;;  %vm386_vm1 = vcmask 31744  }
   0xc   : > { %299 = vmatpush.msra.mxu0 %v275_v0  ;;  %325 = vmatpush.msra.mxu1 %v320_v1  ;;  %v318_v3 = vld [vmem:[%s649_s3 + $0x68] sm:$0xff]  ;;  %s446_s11 = sshll.u32 %s655_s25, 3  ;;  %v317_v4 = vld [vmem:[%s649_s3 + $0x60] sm:$0xff]  ;;  %v316_v6 = vld [vmem:[%s649_s3 + $0x58] sm:$0xff] }
   0xd   : > { %s269_s16 = scalar_lea.vmem %s646_s0, %s446_s11  ;;  %v315_v7 = vld [vmem:[%s649_s3 + $0x50] sm:$0xff]  ;;  %v314_v8 = vld [vmem:[%s649_s3 + $0x48] sm:$0xff]  ;;  %v313_v9 = vld [vmem:[%s649_s3 + $0x40] sm:$0xff]  ;;  %s273_s21 = scalar_lea.vmem %s653_s7, %s446_s11 }
   0xe   : > { %326 = vmatpush.msra.mxu1 %v319_v2  ;;  %v274_v5 = vld [vmem:[%s269_s16] sm:$0xff]  ;;  %v312_v10 = vld [vmem:[%s649_s3 + $0x38] sm:$0xff]  ;;  %v311_v11 = vld [vmem:[%s649_s3 + $0x30] sm:$0xff] }
   0xf   : > { %448 = vmatmul.msk.f32.vlgmr.msra.gmra.mxu0 %vm280_vm0, %v274_v5  ;;  %v310_v12 = vld [vmem:[%s649_s3 + $0x28] sm:$0xff]  ;;  %v309_v13 = vld [vmem:[%s649_s3 + $0x20] sm:$0xff]  ;;  %v308_v14 = vld [vmem:[%s649_s3 + $0x18] sm:$0xff] }
  0x10   : > { %327 = vmatpush.msra.mxu1 %v318_v3  ;;  %v307_v15 = vld [vmem:[%s649_s3 + $0x10] sm:$0xff]  ;;  %v306_v16 = vld [vmem:[%s649_s3 + $0x8] sm:$0xff]  ;;  %v305_v17 = vld [vmem:[%s649_s3] sm:$0xff] }
  0x11   : > { %v361_v18 = vld [vmem:[%s651_s5 + $0x78] sm:$0xff]  ;;  %v360_v19 = vld [vmem:[%s651_s5 + $0x70] sm:$0xff]  ;;  %v359_v20 = vld [vmem:[%s651_s5 + $0x68] sm:$0xff] }
  0x12   : > { %328 = vmatpush.msra.mxu1 %v317_v4  ;;  %366 = vmatpush.msra.mxu2 %v361_v18  ;;  %v358_v21 = vld [vmem:[%s651_s5 + $0x60] sm:$0xff]  ;;  %v357_v22 = vld [vmem:[%s651_s5 + $0x58] sm:$0xff]  ;;  %v356_v23 = vld [vmem:[%s651_s5 + $0x50] sm:$0xff] }
  0x13   : > { %v355_v24 = vld [vmem:[%s651_s5 + $0x48] sm:$0xff]  ;;  %v354_v25 = vld [vmem:[%s651_s5 + $0x40] sm:$0xff]  ;;  %v353_v26 = vld [vmem:[%s651_s5 + $0x38] sm:$0xff] }
  0x14   : > { %329 = vmatpush.msra.mxu1 %v316_v6  ;;  %367 = vmatpush.msra.mxu2 %v360_v19  ;;  %v352_v27 = vld [vmem:[%s651_s5 + $0x30] sm:$0xff]  ;;  %v351_v28 = vld [vmem:[%s651_s5 + $0x28] sm:$0xff]  ;;  %v459_v29 = vld [vmem:[%s648_s2] ss:$0 sm:$0xff] }
  0x15   : > { %v350_v33 = vld [vmem:[%s651_s5 + $0x20] sm:$0xff]  ;;  %v349_v34 = vld [vmem:[%s651_s5 + $0x18] sm:$0xff]  ;;  %v348_v35 = vld [vmem:[%s651_s5 + $0x10] sm:$0xff] }
  0x16   : > { %330 = vmatpush.msra.mxu1 %v315_v7  ;;  %368 = vmatpush.msra.mxu2 %v359_v20  ;;  %v347_v36 = vld [vmem:[%s651_s5 + $0x8] sm:$0xff]  ;;  %v346_v37 = vld [vmem:[%s651_s5] sm:$0xff] }
  0x17   : > { %v460_v38 = vld [vmem:[%s650_s4] ss:$0 sm:$0xff] }
  0x18   : > { %331 = vmatpush.msra.mxu1 %v314_v8  ;;  %369 = vmatpush.msra.mxu2 %v358_v21  ;;  %v461_v42 = vld [vmem:[%s652_s6] ss:$0 sm:$0xff] }
  0x1a   : > { %332 = vmatpush.msra.mxu1 %v313_v9  ;;  %370 = vmatpush.msra.mxu2 %v357_v22 }
  0x1c   : > { %333 = vmatpush.msra.mxu1 %v312_v10  ;;  %371 = vmatpush.msra.mxu2 %v356_v23 }
  0x1e   : > { %334 = vmatpush.msra.mxu1 %v311_v11  ;;  %372 = vmatpush.msra.mxu2 %v355_v24 }
  0x20   : > { %335 = vmatpush.msra.mxu1 %v310_v12  ;;  %373 = vmatpush.msra.mxu2 %v354_v25 }
  0x22   : > { %336 = vmatpush.msra.mxu1 %v309_v13  ;;  %374 = vmatpush.msra.mxu2 %v353_v26 }
  0x24   : > { %337 = vmatpush.msra.mxu1 %v308_v14  ;;  %375 = vmatpush.msra.mxu2 %v352_v27 }
  0x26   : > { %338 = vmatpush.msra.mxu1 %v307_v15  ;;  %376 = vmatpush.msra.mxu2 %v351_v28 }
  0x28   : > { %339 = vmatpush.msra.mxu1 %v306_v16  ;;  %377 = vmatpush.msra.mxu2 %v350_v33 }
  0x2a   : > { %340 = vmatpush.msra.mxu1 %v305_v17  ;;  %378 = vmatpush.msra.mxu2 %v349_v34 }
  0x2c   : > { %379 = vmatpush.msra.mxu2 %v348_v35 }
  0x2e   : > { %380 = vmatpush.msra.mxu2 %v347_v36 }
  0x30   : > { %381 = vmatpush.msra.mxu2 %v346_v37 }
  0x8c   : > { %v301_v30 = vpop.f32.mrf.mxu0 }
  0x8d   : > { %v302_v31 = vadd.f32 %v459_v29, %v301_v30 }
  0x8f   : > { %462 = vtanh.f32 %v302_v31 }
  0x95   : > { %v463_v32 = vpop.eup %462 }
  0x96   : > { %341 = vmatmul.f32.vlgmr.msra.gmra.mxu1 %v463_v32 }
 0x113   : > { %v342_v39 = vpop.f32.mrf.mxu1 }
 0x114   : > { %v343_v40 = vadd.f32 %v460_v38, %v342_v39 }
 0x116   : > { %464 = vtanh.f32 %v343_v40 }
 0x11c   : > { %v465_v41 = vpop.eup %464 }
 0x11d   : > { %382 = vmatmul.f32.vlgmr.msra.gmra.mxu2 %v465_v41 }
 0x1a0   : > { %v383_v43 = vpop.f32.mrf.mxu2 }
 0x1a1   : > { %v384_v44 = vadd.f32 %v461_v42, %v383_v43 }
 0x1a3   : > { %387 = vst.msk [vmem:[%s273_s21] sm:$0xff] %vm386_vm1, %v384_v44 }
 0x1a4 PF: > { %s17_s24 = sadd.s32 1, %s472_s24  }
 0x1a5   : > { %p14_p4 = scmp.ge.s32.totalorder %s17_s24, 4  }
 0x1a7   :  { %16 = sbr.rel (!%p14_p4) target bundleno = 1 (0x1), region = 78 }

</bundles_post_ra>
